<compile_context>
chip_gen: v7x
topology: tpu7x:2x2x1
jax: 0.10.0
libtpu: 0.0.40
codegen_flags: <defaults>
</compile_context>

<pallas_src>
import jax
import jax.numpy as jnp
from jax.experimental import pallas as pl
from jax.experimental.pallas import tpu as pltpu

LANE = 128  # TPU lane width; output columns are padded to this for lane-dense stores.


def qnet_kernel(x_ref, w1_ref, b1_ref, w2_ref, b2_ref, o_ref):
    # Hidden layer: (TB, S) @ (S, H) + (1, H) -> ReLU, f32 accumulation on the MXU.
    h = jnp.dot(x_ref[...], w1_ref[...], preferred_element_type=jnp.float32)
    h = jnp.maximum(h + b1_ref[...], 0.0)
    # Output layer: (TB, H) @ (H, 128) + (1, 128) -- lane-dense (action_dim padded to 128
    # with exact zeros, sliced off in the wrapper).
    out = jnp.dot(h, w2_ref[...], preferred_element_type=jnp.float32)
    o_ref[...] = (out + b2_ref[...]).astype(o_ref.dtype)


def qnetwork_forward(x, w1, b1, w2p, b2p, action_dim, *, batch_tile=512):
    """x: (B, state_dim) f32. w2p/b2p are lane-padded to 128 output columns.

    Returns (B, action_dim) f32.
    """
    B, S = x.shape
    H = w1.shape[1]
    Ap = w2p.shape[1]  # lane-padded output width (128)

    if B <= batch_tile:
        # Latency-bound regime: single shot, no grid / pipeline machinery at all.
        out = pl.pallas_call(
            qnet_kernel,
            out_shape=jax.ShapeDtypeStruct((B, Ap), jnp.float32),
            in_specs=[pl.BlockSpec(memory_space=pltpu.MemorySpace.VMEM)] * 5,
            out_specs=pl.BlockSpec(memory_space=pltpu.MemorySpace.VMEM),
        )(x, w1, b1, w2p, b2p)
        return out[:, :action_dim]

    # Large batch: tile only the batch axis. Weights map to block (0, 0) every step,
    # so they stay resident in VMEM; only the x stream is pipelined (double-buffered).
    num_tiles = pl.cdiv(B, batch_tile)
    Bp = num_tiles * batch_tile
    if Bp != B:
        x = jnp.pad(x, ((0, Bp - B), (0, 0)))  # zero rows, sliced off below

    out = pl.pallas_call(
        qnet_kernel,
        out_shape=jax.ShapeDtypeStruct((Bp, Ap), jnp.float32),
        grid=(num_tiles,),
        in_specs=[
            pl.BlockSpec((batch_tile, S), lambda i: (i, 0)),
            pl.BlockSpec((S, H), lambda i: (0, 0)),
            pl.BlockSpec((1, H), lambda i: (0, 0)),
            pl.BlockSpec((H, Ap), lambda i: (0, 0)),
            pl.BlockSpec((1, Ap), lambda i: (0, 0)),
        ],
        out_specs=pl.BlockSpec((batch_tile, Ap), lambda i: (i, 0)),
        compiler_params=pltpu.CompilerParams(
            # Batch tiles are independent -> shard across both TensorCores on v7x.
            dimension_semantics=("parallel",)
        ),
    )(x, w1, b1, w2p, b2p)
    return out[:B, :action_dim]


def init_params(key, state_dim, hidden, action_dim):
    """Deterministic synthetic init (PyTorch-default-like uniform bounds).

    Returns weights pre-transposed to (in, out); w2/b2 are zero-padded to 128
    output columns so the kernel's stores are lane-dense.
    """
    k1, k2, k3, k4 = jax.random.split(key, 4)
    bound1 = 1.0 / jnp.sqrt(state_dim)
    bound2 = 1.0 / jnp.sqrt(hidden)
    w1 = jax.random.uniform(k1, (state_dim, hidden), jnp.float32, -bound1, bound1)
    b1 = jax.random.uniform(k2, (1, hidden), jnp.float32, -bound1, bound1)
    w2 = jax.random.uniform(k3, (hidden, action_dim), jnp.float32, -bound2, bound2)
    b2 = jax.random.uniform(k4, (1, action_dim), jnp.float32, -bound2, bound2)
    # Exact-zero lane padding of the output dimension (action_dim -> 128).
    w2p = jnp.zeros((hidden, LANE), jnp.float32).at[:, :action_dim].set(w2)
    b2p = jnp.zeros((1, LANE), jnp.float32).at[:, :action_dim].set(b2)
    return w1, b1, w2, b2, w2p, b2p


if __name__ == "__main__":
    # CartPole-v1: state_dim = 4, action_dim = 2
    state_dim, hidden, action_dim = 4, 128, 2

    key = jax.random.PRNGKey(0)
    kx, kp, kx2 = jax.random.split(key, 3)
    w1, b1, w2, b2, w2p, b2p = init_params(kp, state_dim, hidden, action_dim)

    def ref_fn(xin):
        return jnp.maximum(xin @ w1 + b1, 0.0) @ w2 + b2

    # --- Small-batch (latency) path: no grid, whole arrays in VMEM ---
    batch = 8
    x = jax.random.normal(kx, (batch, state_dim), jnp.float32)
    q_small = qnetwork_forward(x, w1, b1, w2p, b2p, action_dim)
    jax.block_until_ready(q_small)
    assert q_small.shape == (batch, action_dim)
    assert jnp.allclose(q_small, ref_fn(x), atol=1e-5, rtol=1e-5)

    # --- Large-batch (replay-buffer) path: batch-tiled grid, parallel semantics ---
    big_batch = 1000  # non-multiple of the tile to exercise row padding
    x_big = jax.random.normal(kx2, (big_batch, state_dim), jnp.float32)
    q_big = qnetwork_forward(x_big, w1, b1, w2p, b2p, action_dim, batch_tile=512)
    jax.block_until_ready(q_big)
    assert q_big.shape == (big_batch, action_dim)
    assert jnp.allclose(q_big, ref_fn(x_big), atol=1e-5, rtol=1e-5)

    print("KERNEL_OK")
</pallas_src>

<mosaic_0001>
module attributes {stable_mosaic.version = 11 : i64} {
  func.func @qnet_kernel(%arg0: memref<8x4xf32, #tpu.memory_space<vmem>>, %arg1: memref<4x128xf32, #tpu.memory_space<vmem>>, %arg2: memref<1x128xf32, #tpu.memory_space<vmem>>, %arg3: memref<128x128xf32, #tpu.memory_space<vmem>>, %arg4: memref<1x128xf32, #tpu.memory_space<vmem>>, %arg5: memref<8x128xf32, #tpu.memory_space<vmem>>) attributes {dimension_semantics = [], scalar_prefetch = 0 : i64, scratch_operands = 0 : i64, tpu.core_type = #tpu.core_type<tc>} {
    %c0 = arith.constant 0 : index
    %c0_0 = arith.constant 0 : index
    %0 = vector.load %arg0[%c0, %c0_0] : memref<8x4xf32, #tpu.memory_space<vmem>>, vector<8x4xf32>
    %c0_1 = arith.constant 0 : index
    %c0_2 = arith.constant 0 : index
    %1 = vector.load %arg1[%c0_1, %c0_2] : memref<4x128xf32, #tpu.memory_space<vmem>>, vector<4x128xf32>
    %cst = arith.constant dense<0.000000e+00> : vector<8x128xf32>
    %2 = tpu.matmul %0, %1, %cst {dimension_numbers = #tpu.dot_dimension_numbers<[1], [0], [0], [1], [0, 0, 1, 1], [], []>} : vector<8x4xf32>, vector<4x128xf32>, vector<8x128xf32> -> vector<8x128xf32>
    %c0_3 = arith.constant 0 : index
    %c0_4 = arith.constant 0 : index
    %3 = vector.load %arg2[%c0_3, %c0_4] : memref<1x128xf32, #tpu.memory_space<vmem>>, vector<1x128xf32>
    %4 = vector.broadcast %3 : vector<1x128xf32> to vector<8x128xf32>
    %5 = arith.addf %2, %4 : vector<8x128xf32>
    %cst_5 = arith.constant 0.000000e+00 : f32
    %6 = vector.broadcast %cst_5 : f32 to vector<8x128xf32>
    %7 = arith.maximumf %5, %6 : vector<8x128xf32>
    %c0_6 = arith.constant 0 : index
    %c0_7 = arith.constant 0 : index
    %8 = vector.load %arg3[%c0_6, %c0_7] : memref<128x128xf32, #tpu.memory_space<vmem>>, vector<128x128xf32>
    %cst_8 = arith.constant dense<0.000000e+00> : vector<8x128xf32>
    %9 = tpu.matmul %7, %8, %cst_8 {dimension_numbers = #tpu.dot_dimension_numbers<[1], [0], [0], [1], [0, 0, 1, 1], [], []>} : vector<8x128xf32>, vector<128x128xf32>, vector<8x128xf32> -> vector<8x128xf32>
    %c0_9 = arith.constant 0 : index
    %c0_10 = arith.constant 0 : index
    %10 = vector.load %arg4[%c0_9, %c0_10] : memref<1x128xf32, #tpu.memory_space<vmem>>, vector<1x128xf32>
    %11 = vector.broadcast %10 : vector<1x128xf32> to vector<8x128xf32>
    %12 = arith.addf %9, %11 : vector<8x128xf32>
    %c0_11 = arith.constant 0 : index
    %c0_12 = arith.constant 0 : index
    %13 = vector.load %arg5[%c0_11, %c0_12] : memref<8x128xf32, #tpu.memory_space<vmem>>, vector<8x128xf32>
    tpu.vector_store %arg5[%c0_11, %c0_12], %12 {strides = array<i32>} : memref<8x128xf32, #tpu.memory_space<vmem>>, vector<8x128xf32>,
    return
  }
}

</mosaic_0001>

<bundles_post_ra>
// kernel: tpu_custom_call.1
= control target key start
LH: loop header
LB: loop body
LE: loop exit
PB: predicated region body
PF: predicated region fallthrough
CT: control target
= control target key end

     0   :  { %10 = vsyncpa [#allocation3], 0  ;;  %s447_s0 = inlined_call_operand.vmem [shape: f32[8,4], index: 0, kind: input, shape index: {}]   ;;  %s448_s1 = inlined_call_operand.vmem [shape: f32[4,128], index: 1, kind: input, shape index: {}]   ;;  %s449_s2 = inlined_call_operand.vmem [shape: f32[1,128], index: 2, kind: input, shape index: {}]   ;;  %s450_s3 = inlined_call_operand.hbm [shape: f32[128,128], index: 3, kind: input, shape index: {}]   ;;  %s451_s4 = inlined_call_operand.vmem [shape: f32[1,128], index: 4, kind: input, shape index: {}]   ;;  %s452_s5 = inlined_call_operand.hbm [shape: f32[8,128], index: 5, kind: output, shape index: {}]  }
   0x1   :  { %11 = vsyncpa [#allocation4], 0  ;;  %s374_s18 = smov [#allocation2]   ;;  %s326_s22 = scalar_lea.hbm %s450_s3, 2048 }
   0x2   :  { %s23_s19 = sshll.u32 %s374_s18, 4  ;;  %p327_p0 = scmp.ne.s32.totalorder %s450_s3, %s326_s22  ;;  %s24_s19 = int_to_ptr.vmem [resolvable:$true] %s23_s19 }
   0x3   :  { %p330_p1 = scmp.lt.u32.totalorder %s326_s22, %s450_s3 }
   0x5   :  { %p332_p2 = pnand %p330_p1, %p327_p0 }
   0x7   :  { %335 = shalt.err (!%p332_p2)
}
   0x8   :  { %s336_s27 = scalar_lea.vmem %s24_s19, 2048  ;;  %p341_p4 = scmp.lt.s32.totalorder %s24_s19, %s24_s19 }
   0x9   :  { %p337_p3 = scmp.ne.s32.totalorder %s24_s19, %s336_s27  ;;  %p342_p5 = scmp.lt.s32.totalorder %s336_s27, %s336_s27 }
   0xb   :  { %p343_p6 = por %p342_p5, %p341_p4 }
   0xd   :  { %p344_p7 = pnand %p343_p6, %p337_p3 }
   0xf   :  { %347 = shalt.err (!%p344_p7)
}
  0x10   :  { %s375_s28 = smov 128   ;;  %s376_s29 = smov 8  }
  0x11   :  { %29 = dma.hbm_to_vmem [thread:$0]  %s450_s3, 2048, %s24_s19, [#allocation3], %s375_s28, %s375_s28, %s376_s29  }
  0x12   :  { %370 = dma.done.wait [#allocation3], 2048  }
  0x13   :  { %371 = vsyncadd [#allocation3], 4294965248  ;;  %v377_v0 = vmov 0.0   ;;  %vm378_vm0 = vmmov 0   ;;  %v379_v1 = vmov 0.0|0.0   ;;  %vm48_vm1 = vcmask 1043456  }
  0x14   :  { %255 = vmatprep.subr.mxu0 %v377_v0  ;;  %257 = vmatprep.mubr.msk.f32.mxu0 %vm378_vm0, %v377_v0  ;;  %vm44_vm2 = vcmask 31744   ;;  %v36_v2 = vld [vmem:[%s448_s1] sm:$0xf]  ;;  %v124_v5 = vld [vmem:[#allocation2 + $0x8] sm:$0xff]  ;;  %v125_v6 = vld [vmem:[#allocation2 + $0x10] sm:$0xff]  ;;  %s380_s12 = smov [#allocation5]  }
  0x15   :  { %295 = vmatprep.subr.bf16.mxu1 %v379_v1  ;;  %292 = vmatprep.mubr.msk.f32.mxu1 %vm378_vm0, %v377_v0  ;;  %v35_v3 = vld [vmem:[%s447_s0] sm:$0xff]  ;;  %v126_v7 = vld [vmem:[#allocation2 + $0x18] sm:$0xff]  ;;  %v128_v11 = vld [vmem:[#allocation2 + $0x28] sm:$0xff]  ;;  %s223_s13 = sshll.u32 %s380_s12, 4  ;;  %s224_s13 = int_to_ptr.vmem [resolvable:$true] %s223_s13 }
  0x16   :  { %v123_v4 = vld [vmem:[#allocation2] sm:$0xff]  ;;  %256 = vmatpush3.msk.msra.mxu0 %vm48_vm1, %v36_v2  ;;  %v299_v9 = vpack.c.bf16 %v126_v7, %v125_v6  ;;  %v129_v13 = vld [vmem:[#allocation2 + $0x30] sm:$0xff]  ;;  %v130_v14 = vld [vmem:[#allocation2 + $0x38] sm:$0xff]  ;;  %s348_s14 = scalar_lea.vmem %s224_s13, 128  ;;  %p353_p9 = scmp.lt.s32.totalorder %s224_s13, %s224_s13 }
  0x17   :  { %258 = vmatmul.mubr.msk.f32.vlgmr.msra.gmra.mrb[0].mxu0 %vm44_vm2, %v35_v3  ;;  %v296_v8 = vpack.c.bf16 %v124_v5, %v123_v4  ;;  %v127_v10 = vld [vmem:[#allocation2 + $0x20] sm:$0xff]  ;;  %v305_v15 = vpack.c.bf16 %v130_v14, %v129_v13  ;;  %v132_v17 = vld [vmem:[#allocation2 + $0x48] sm:$0xff]  ;;  %v133_v19 = vld [vmem:[#allocation2 + $0x50] sm:$0xff]  ;;  %p349_p8 = scmp.ne.s32.totalorder %s224_s13, %s348_s14  ;;  %p354_p10 = scmp.lt.s32.totalorder %s348_s14, %s348_s14 }
  0x18   :  { %v302_v12 = vpack.c.bf16 %v128_v11, %v127_v10  ;;  %v131_v16 = vld [vmem:[#allocation2 + $0x40] sm:$0xff]  ;;  %v134_v20 = vld [vmem:[#allocation2 + $0x58] sm:$0xff]  ;;  %v136_v23 = vld [vmem:[#allocation2 + $0x68] sm:$0xff] }
  0x19   :  { %297 = vmatpush3.bf16.msra.mxu1 %v296_v8  ;;  %v308_v18 = vpack.c.bf16 %v132_v17, %v131_v16  ;;  %v311_v21 = vpack.c.bf16 %v134_v20, %v133_v19  ;;  %v135_v22 = vld [vmem:[#allocation2 + $0x60] sm:$0xff]  ;;  %v137_v25 = vld [vmem:[#allocation2 + $0x70] sm:$0xff]  ;;  %v138_v26 = vld [vmem:[#allocation2 + $0x78] sm:$0xff]  ;;  %p355_p11 = por %p354_p10, %p353_p9 }
  0x1a   :  { %298 = vmatprep.subr.bf16.mxu1 %v379_v1  ;;  %v314_v24 = vpack.c.bf16 %v136_v23, %v135_v22  ;;  %v317_v27 = vpack.c.bf16 %v138_v26, %v137_v25  ;;  %v232_v28 = vld [vmem:[%s449_s2] ss:$0 sm:$0xff] }
  0x1b   :  { %v235_v33 = vld [vmem:[%s451_s4] ss:$0 sm:$0xff]  ;;  %p356_p12 = pnand %p355_p11, %p349_p8 }
  0x1d   :  { %300 = vmatpush3.bf16.msra.mxu1 %v299_v9 }
  0x1e   :  { %301 = vmatprep.subr.bf16.mxu1 %v379_v1 }
  0x21   :  { %303 = vmatpush3.bf16.msra.mxu1 %v302_v12 }
  0x22   :  { %304 = vmatprep.subr.bf16.mxu1 %v379_v1 }
  0x25   :  { %306 = vmatpush3.bf16.msra.mxu1 %v305_v15 }
  0x26   :  { %307 = vmatprep.subr.bf16.mxu1 %v379_v1 }
  0x29   :  { %309 = vmatpush3.bf16.msra.mxu1 %v308_v18 }
  0x2a   :  { %310 = vmatprep.subr.bf16.mxu1 %v379_v1 }
  0x2d   :  { %312 = vmatpush3.bf16.msra.mxu1 %v311_v21 }
  0x2e   :  { %313 = vmatprep.subr.bf16.mxu1 %v379_v1 }
  0x31   :  { %315 = vmatpush3.bf16.msra.mxu1 %v314_v24 }
  0x32   :  { %316 = vmatprep.subr.bf16.mxu1 %v379_v1 }
  0x35   :  { %318 = vmatpush3.bf16.msra.mxu1 %v317_v27 }
  0xea   :  { %v118_v29 = vpop.f32.mrb[0].mxu0 }
  0xeb   :  { %v119_v30 = vadd.f32 %v232_v28, %v118_v29  ;;  %v259_v31 = vpop.f32.mrb[1].mxu0 }
  0xed   :  { %v122_v32 = vmax.f32 %v119_v30, 0.0 }
  0xef   :  { %293 = vmatmul.mubr.f32.vlgmr.msra.gmra.mrb[0].mxu1 %v122_v32 }
 0x1c2   :  { %v212_v34 = vpop.f32.mrb[0].mxu1 }
 0x1c3   :  { %v213_v35 = vadd.f32 %v235_v33, %v212_v34  ;;  %v294_v36 = vpop.f32.mrb[1].mxu1 }
 0x1c5   :  { %216 = vst [vmem:[#allocation5] sm:$0xff] %v213_v35 }
 0x1c6   :  { %359 = shalt.err (!%p356_p12)
}
 0x1c7   :  { %s360_s16 = scalar_lea.hbm %s452_s5, 128 }
 0x1c8   :  { %p361_p13 = scmp.ne.s32.totalorder %s452_s5, %s360_s16  ;;  %p364_p0 = scmp.lt.u32.totalorder %s360_s16, %s452_s5 }
 0x1ca   :  { %p366_p1 = pnand %p364_p0, %p361_p13 }
 0x1cc   :  { %369 = shalt.err (!%p366_p1)
}
 0x1cd   :  { %226 = dma.vmem_to_hbm [thread:$0]  %s224_s13, 128, %s452_s5, [#allocation4]  }
 0x1ce   :  { %372 = dma.done.wait [#allocation4], 128  }
 0x1cf   :  { %373 = vsyncadd [#allocation4], 4294967168 }
 0x1d0   :  { %230 = vsyncpa [#allocation3], 1 }
 0x1d1   :  { %231 = vsyncpa [#allocation4], 1 }

</bundles_post_ra>
